<compile_context>
chip_gen: v7x
topology: tpu7x:2x2x1
jax: 0.10.0
libtpu: 0.0.40
codegen_flags: <defaults>
</compile_context>

<pallas_src>
import functools
import math

import jax
import jax.numpy as jnp
from jax import lax
from jax.experimental import pallas as pl
from jax.experimental.pallas import tpu as pltpu

FEATURE_SIZE = 32               # logical backbone feature size
TASK_WEIGHTS = (1.0, 1.0, 1.0)  # valence, arousal, danceability
_SUBLANE = 8
_MAX_ROW_TILE = 1024            # 512-1024 row tiles already sit at ~85%+ of HBM roofline


def _vmem_budget_bytes():
    """Per-generation VMEM budget: ~3/4 of physical per-core VMEM.

    v5e/v6e: 128 MiB -> ~96 MiB budget; v7x: 64 MiB -> ~48 MiB budget.
    Falls back to the conservative 48 MiB if the query is unavailable
    (e.g. interpret mode on a non-TPU host)."""
    cap = None
    try:
        cap = getattr(pltpu.get_tpu_info(), "vmem_capacity_bytes", None)
    except Exception:
        cap = None
    if not cap:
        cap = 64 * 1024 * 1024
    return int(cap) * 3 // 4


def _multitask_kernel(x_ref, wb_ref, bb_ref, wh_ref, bh_ref, tgt_ref,
                      out_ref, sse_ref, *, batch, tile_m):
    """One (tile_m, D) row tile of the fused forward pass.

    x_ref   : (TM, D)   original dtype (f32 here; bf16 upstream halves traffic again)
    wb_ref  : (D, F)    bf16  backbone weight (resident, constant index_map)
    bb_ref  : (1, F)    f32   backbone bias
    wh_ref  : (F, 3)    bf16  head weights (valence | arousal | danceability)
    bh_ref  : (1, 3)    f32   head biases
    tgt_ref : (TM, 3)   f32   targets tile
    out_ref : (TM, 3)   f32   predictions tile
    sse_ref : (1, 1, 3) f32   per-tile partial sum of squared errors
    """
    i = pl.program_id(0)

    # Backbone: flatten -> Linear -> ReLU.  Cast to bf16 right before the MXU op
    # (bf16 x bf16 -> f32 accumulation); no wrapper-side cast/pad copy of x.
    x_bf = x_ref[...].astype(jnp.bfloat16)
    feats = jnp.dot(x_bf, wb_ref[...], preferred_element_type=jnp.float32)
    feats = jnp.maximum(feats + bb_ref[...], 0.0)

    # Three heads fused into one (F, 3) matmul, bf16-in / f32-acc.
    outs = jnp.dot(feats.astype(jnp.bfloat16), wh_ref[...],
                   preferred_element_type=jnp.float32) + bh_ref[...]
    out_ref[...] = outs

    # Per-tile partial SSE.  Rows past the true batch (only possible in the last,
    # partial tile) are removed with a select, which is safe even if the padded tail
    # contains garbage/NaN; their prediction rows are clamped away on writeback.
    row_ids = i * tile_m + lax.broadcasted_iota(jnp.int32, (tile_m, 1), 0)
    diff = outs - tgt_ref[...]
    sq = jnp.where(row_ids < batch, diff * diff, 0.0)
    sse_ref[...] = jnp.sum(sq, axis=0, keepdims=True).reshape(1, 1, 3)


def prepare_params(params):
    """One-time cast of the (static) weights, done OUTSIDE the per-call jitted forward
    so no per-call convert kernels sit on the latency path."""
    return {
        "wb": params["wb"].astype(jnp.bfloat16),                  # (D, F)
        "bb": params["bb"].astype(jnp.float32).reshape(1, -1),    # (1, F)
        "wh": params["wh"].astype(jnp.bfloat16),                  # (F, 3)
        "bh": params["bh"].astype(jnp.float32).reshape(1, -1),    # (1, 3)
    }


def multitask_regressor_forward(x, targets, lengths, prepared):
    """Mirrors MultitaskRegressor.forward(x, targets, lengths)."""
    del lengths  # TODO(synk): LSTM-backbone path consuming `lengths` not implemented.
    B = x.shape[0]
    D = math.prod(x.shape[1:])
    x2 = x.reshape(B, D)  # no dtype change, no padding: streamed as-is

    wb, bb, wh, bh = prepared["wb"], prepared["bb"], prepared["wh"], prepared["bh"]
    F = wb.shape[1]

    tgt = jnp.concatenate(
        [targets["valence"], targets["arousal"], targets["danceability"]], axis=1
    ).astype(jnp.float32)                                         # (B, 3)

    # --- derive the row tile from D, dtype and the per-generation VMEM budget ---
    x_bytes = jnp.dtype(x2.dtype).itemsize
    budget = _vmem_budget_bytes()
    # Resident weights (default double-buffered; pl.Buffered(1) deliberately not used).
    resident = 2 * (wb.size * wb.dtype.itemsize + bb.size * 4
                    + wh.size * wh.dtype.itemsize + bh.size * 4)
    per_row = 2 * (D * x_bytes + 3 * 4 + 3 * 4)   # x + targets + preds, double-buffered
    avail = budget - resident - (2 << 20)          # slack for partial-SSE out / scratch
    tm_cap = int(max(_SUBLANE,
                     min(_MAX_ROW_TILE, (avail // per_row) // _SUBLANE * _SUBLANE)))
    # TODO(synk): for very large D (> ~8K) add a K grid axis over D with a VMEM f32
    # accumulator so the x tile stays bounded instead of shrinking tm_cap.

    if B <= tm_cap:
        tile_m, n_tiles = B, 1      # single tile: every block equals the full array dims
    else:
        tile_m = tm_cap             # multiple of 8; last tile is partial (masked in-kernel)
        n_tiles = pl.cdiv(B, tile_m)

    kernel = functools.partial(_multitask_kernel, batch=B, tile_m=tile_m)

    flops = 2 * B * D * F + 2 * B * F * 3 + 10 * B * 3
    bytes_accessed = (B * D * x_bytes + wb.size * wb.dtype.itemsize + bb.size * 4
                      + wh.size * wh.dtype.itemsize + bh.size * 4
                      + B * 3 * 4 * 2 + n_tiles * 3 * 4)

    preds, sse = pl.pallas_call(
        kernel,
        out_shape=(
            jax.ShapeDtypeStruct((B, 3), jnp.float32),
            jax.ShapeDtypeStruct((n_tiles, 1, 3), jnp.float32),
        ),
        grid_spec=pltpu.PrefetchScalarGridSpec(
            num_scalar_prefetch=0,
            grid=(n_tiles,),
            in_specs=[
                pl.BlockSpec((tile_m, D), lambda i: (i, 0)),  # x tile (streamed, raw dtype)
                pl.BlockSpec((D, F), lambda i: (0, 0)),       # backbone weight (resident)
                pl.BlockSpec((1, F), lambda i: (0, 0)),       # backbone bias
                pl.BlockSpec((F, 3), lambda i: (0, 0)),       # head weights
                pl.BlockSpec((1, 3), lambda i: (0, 0)),       # head biases
                pl.BlockSpec((tile_m, 3), lambda i: (i, 0)),  # targets tile (streamed)
            ],
            out_specs=(
                pl.BlockSpec((tile_m, 3), lambda i: (i, 0)),     # predictions tile
                pl.BlockSpec((1, 1, 3), lambda i: (i, 0, 0)),    # per-tile partial SSE
            ),
        ),
        compiler_params=pltpu.CompilerParams(
            # Per-tile partial losses -> no cross-step state -> the batch axis can run
            # in parallel (both TensorCores on v7x).
            dimension_semantics=("parallel",),
            vmem_limit_bytes=int(budget),
        ),
        cost_estimate=pl.CostEstimate(
            flops=int(flops), transcendentals=0, bytes_accessed=int(bytes_accessed)),
    )(x2, wb, bb, wh, bh, tgt)

    # Tiny finalize in the wrapper: sum partials, mean over the true batch, task weights.
    per_task_sse = jnp.sum(sse, axis=(0, 1))                 # (3,)
    per_task_mse = per_task_sse / float(B)
    task_w = jnp.asarray(TASK_WEIGHTS, dtype=jnp.float32)
    total_loss = jnp.sum(per_task_mse * task_w)

    outputs = {
        "valence": preds[:, 0:1],
        "arousal": preds[:, 1:2],
        "danceability": preds[:, 2:3],
    }
    individual_losses = {
        "valence": per_task_mse[0],
        "arousal": per_task_mse[1],
        "danceability": per_task_mse[2],
        "total": total_loss,
    }
    return total_loss, outputs, individual_losses


def init_params(key, in_dim, feature_size):
    k1, k2, k3, k4 = jax.random.split(key, 4)
    scale_b = 1.0 / (float(in_dim) ** 0.5)
    scale_h = 1.0 / (float(feature_size) ** 0.5)
    wb = jax.random.uniform(k1, (in_dim, feature_size), jnp.float32, -scale_b, scale_b)
    bb = jax.random.uniform(k2, (1, feature_size), jnp.float32, -scale_b, scale_b)
    # Three heads (feature_size -> 1 each), column-stacked into (F, 3).
    wh = jax.random.uniform(k3, (feature_size, 3), jnp.float32, -scale_h, scale_h)
    bh = jax.random.uniform(k4, (1, 3), jnp.float32, -scale_h, scale_h)
    return {"wb": wb, "bb": bb, "wh": wh, "bh": bh}


def _reference(x, targets, params):
    """Pure-JAX reference matching the kernel's bf16-input / f32-accumulate math.
    (A strict f32 PyTorch path differs only by the documented bf16 casts.)"""
    B = x.shape[0]
    xf = x.reshape(B, -1)
    feats = jnp.dot(xf.astype(jnp.bfloat16), params["wb"].astype(jnp.bfloat16),
                    preferred_element_type=jnp.float32)
    feats = jnp.maximum(feats + params["bb"].reshape(1, -1), 0.0)
    outs = jnp.dot(feats.astype(jnp.bfloat16), params["wh"].astype(jnp.bfloat16),
                   preferred_element_type=jnp.float32) + params["bh"].reshape(1, -1)
    tgt = jnp.concatenate(
        [targets["valence"], targets["arousal"], targets["danceability"]], axis=1)
    per_task = jnp.mean((outs - tgt) ** 2, axis=0)
    total = jnp.sum(per_task * jnp.asarray(TASK_WEIGHTS))
    return outs, per_task, total


if __name__ == "__main__":
    B, C, H, W = 2, 4, 16, 16
    key = jax.random.PRNGKey(0)
    kx, kv, ka, kd, kp = jax.random.split(key, 5)

    x = jax.random.normal(kx, (B, C, H, W), jnp.float32)
    targets = {
        "valence": jax.random.normal(kv, (B, 1), jnp.float32),
        "arousal": jax.random.normal(ka, (B, 1), jnp.float32),
        "danceability": jax.random.normal(kd, (B, 1), jnp.float32),
    }
    lengths = jnp.full((B,), H, jnp.int32)  # unused (non-LSTM backbone)

    params = init_params(kp, C * H * W, FEATURE_SIZE)
    prepared = prepare_params(params)  # one-time cast, outside the jitted forward

    fwd = jax.jit(lambda x, t, l: multitask_regressor_forward(x, t, l, prepared))
    total_loss, outputs, individual_losses = fwd(x, targets, lengths)
    jax.block_until_ready(total_loss)
    jax.block_until_ready(outputs)

    # Sanity check against the pure-JAX reference (same bf16/f32 math path).
    ref_outs, ref_per_task, ref_total = _reference(x, targets, params)
    outs_stacked = jnp.concatenate(
        [outputs["valence"], outputs["arousal"], outputs["danceability"]], axis=1)
    assert jnp.allclose(outs_stacked, ref_outs, atol=2e-3, rtol=2e-3)
    assert jnp.allclose(total_loss, ref_total, atol=2e-3, rtol=2e-3)
    assert jnp.allclose(individual_losses["valence"], ref_per_task[0], atol=2e-3, rtol=2e-3)
    assert jnp.allclose(individual_losses["arousal"], ref_per_task[1], atol=2e-3, rtol=2e-3)
    assert jnp.allclose(individual_losses["danceability"], ref_per_task[2], atol=2e-3, rtol=2e-3)

    print("KERNEL_OK")
</pallas_src>

<mosaic_0001>
module attributes {stable_mosaic.version = 11 : i64} {
  func.func @_multitask_kernel(%arg0: i32, %arg1: memref<2x1024xf32, #tpu.memory_space<vmem>>, %arg2: memref<1024x32xbf16, #tpu.memory_space<vmem>>, %arg3: memref<1x32xf32, #tpu.memory_space<vmem>>, %arg4: memref<32x3xbf16, #tpu.memory_space<vmem>>, %arg5: memref<1x3xf32, #tpu.memory_space<vmem>>, %arg6: memref<2x3xf32, #tpu.memory_space<vmem>>, %arg7: memref<2x3xf32, #tpu.memory_space<vmem>>, %arg8: memref<1x1x3xf32, #tpu.memory_space<vmem>>) attributes {dimension_semantics = [#tpu.dimension_semantics<parallel>], iteration_bounds = array<i64: 1>, scalar_prefetch = 0 : i64, scratch_operands = 0 : i64, tpu.core_type = #tpu.core_type<tc>, window_params = [{transform_indices = @transform_0, window_bounds = array<i64: 2, 1024>}, {pipeline_mode = #tpu.pipeline_mode<synchronous>, transform_indices = @transform_1, window_bounds = array<i64: 1024, 32>}, {pipeline_mode = #tpu.pipeline_mode<synchronous>, transform_indices = @transform_2, window_bounds = array<i64: 1, 32>}, {pipeline_mode = #tpu.pipeline_mode<synchronous>, transform_indices = @transform_3, window_bounds = array<i64: 32, 3>}, {pipeline_mode = #tpu.pipeline_mode<synchronous>, transform_indices = @transform_4, window_bounds = array<i64: 1, 3>}, {transform_indices = @transform_5, window_bounds = array<i64: 2, 3>}, {transform_indices = @transform_6, window_bounds = array<i64: 2, 3>}, {transform_indices = @transform_7, window_bounds = array<i64: 1, 1, 3>}]} {
    %c0 = arith.constant 0 : index
    %c0_0 = arith.constant 0 : index
    %0 = vector.load %arg1[%c0, %c0_0] : memref<2x1024xf32, #tpu.memory_space<vmem>>, vector<2x1024xf32>
    %1 = arith.truncf %0 : vector<2x1024xf32> to vector<2x1024xbf16>
    %c0_1 = arith.constant 0 : index
    %c0_2 = arith.constant 0 : index
    %2 = vector.load %arg2[%c0_1, %c0_2] : memref<1024x32xbf16, #tpu.memory_space<vmem>>, vector<1024x32xbf16>
    %cst = arith.constant dense<0.000000e+00> : vector<2x32xf32>
    %3 = tpu.matmul %1, %2, %cst {dimension_numbers = #tpu.dot_dimension_numbers<[1], [0], [0], [1], [0, 0, 1, 1], [], []>} : vector<2x1024xbf16>, vector<1024x32xbf16>, vector<2x32xf32> -> vector<2x32xf32>
    %c0_3 = arith.constant 0 : index
    %c0_4 = arith.constant 0 : index
    %4 = vector.load %arg3[%c0_3, %c0_4] : memref<1x32xf32, #tpu.memory_space<vmem>>, vector<1x32xf32>
    %5 = vector.broadcast %4 : vector<1x32xf32> to vector<2x32xf32>
    %6 = arith.addf %3, %5 : vector<2x32xf32>
    %cst_5 = arith.constant 0.000000e+00 : f32
    %7 = vector.broadcast %cst_5 : f32 to vector<2x32xf32>
    %8 = arith.maximumf %6, %7 : vector<2x32xf32>
    %9 = arith.truncf %8 : vector<2x32xf32> to vector<2x32xbf16>
    %c0_6 = arith.constant 0 : index
    %c0_7 = arith.constant 0 : index
    %10 = vector.load %arg4[%c0_6, %c0_7] : memref<32x3xbf16, #tpu.memory_space<vmem>>, vector<32x3xbf16>
    %cst_8 = arith.constant dense<0.000000e+00> : vector<2x3xf32>
    %11 = tpu.matmul %9, %10, %cst_8 {dimension_numbers = #tpu.dot_dimension_numbers<[1], [0], [0], [1], [0, 0, 1, 1], [], []>} : vector<2x32xbf16>, vector<32x3xbf16>, vector<2x3xf32> -> vector<2x3xf32>
    %c0_9 = arith.constant 0 : index
    %c0_10 = arith.constant 0 : index
    %12 = vector.load %arg5[%c0_9, %c0_10] : memref<1x3xf32, #tpu.memory_space<vmem>>, vector<1x3xf32>
    %13 = vector.broadcast %12 : vector<1x3xf32> to vector<2x3xf32>
    %14 = arith.addf %11, %13 : vector<2x3xf32>
    %c0_11 = arith.constant 0 : index
    %c0_12 = arith.constant 0 : index
    %15 = vector.load %arg7[%c0_11, %c0_12] : memref<2x3xf32, #tpu.memory_space<vmem>>, vector<2x3xf32>
    tpu.vector_store %arg7[%c0_11, %c0_12], %14 {strides = array<i32>} : memref<2x3xf32, #tpu.memory_space<vmem>>, vector<2x3xf32>,
    %c2_i32 = arith.constant 2 : i32
    %16 = arith.muli %arg0, %c2_i32 : i32
    %17 = tpu.iota {dimensions = array<i32: 0>} : vector<2x1xi32>
    %18 = vector.broadcast %16 : i32 to vector<2x1xi32>
    %19 = arith.addi %18, %17 : vector<2x1xi32>
    %c0_13 = arith.constant 0 : index
    %c0_14 = arith.constant 0 : index
    %20 = vector.load %arg6[%c0_13, %c0_14] : memref<2x3xf32, #tpu.memory_space<vmem>>, vector<2x3xf32>
    %21 = arith.subf %14, %20 : vector<2x3xf32>
    %c2_i32_15 = arith.constant 2 : i32
    %22 = vector.broadcast %c2_i32_15 : i32 to vector<2x1xi32>
    %23 = arith.cmpi slt, %19, %22 : vector<2x1xi32>
    %24 = arith.mulf %21, %21 : vector<2x3xf32>
    %cst_16 = arith.constant 0.000000e+00 : f32
    %25 = vector.shape_cast %23 : vector<2x1xi1> to vector<2x1xi1>
    %26 = vector.broadcast %25 : vector<2x1xi1> to vector<2x3xi1>
    %27 = vector.broadcast %cst_16 : f32 to vector<2x3xf32>
    %28 = arith.select %26, %24, %27 : vector<2x3xi1>, vector<2x3xf32>
    %cst_17 = arith.constant dense<0.000000e+00> : vector<3xf32>
    %29 = vector.multi_reduction <add>, %28, %cst_17 [0] : vector<2x3xf32> to vector<3xf32>
    %30 = vector.shape_cast %29 : vector<3xf32> to vector<1x3xf32>
    %31 = vector.shape_cast %30 : vector<1x3xf32> to vector<1x1x3xf32>
    %c0_18 = arith.constant 0 : index
    %c0_19 = arith.constant 0 : index
    %c0_20 = arith.constant 0 : index
    %32 = vector.load %arg8[%c0_18, %c0_19, %c0_20] : memref<1x1x3xf32, #tpu.memory_space<vmem>>, vector<1x1x3xf32>
    tpu.vector_store %arg8[%c0_18, %c0_19, %c0_20], %31 {strides = array<i32>} : memref<1x1x3xf32, #tpu.memory_space<vmem>>, vector<1x1x3xf32>,
    return
  }
  func.func @transform_0(%arg0: i32) -> (i32, i32) {
    %c0_i32 = arith.constant 0 : i32
    %c0_i32_0 = arith.constant 0 : i32
    return %arg0, %c0_i32 : i32, i32
  }
  func.func @transform_1(%arg0: i32) -> (i32, i32) {
    %c0_i32 = arith.constant 0 : i32
    %c0_i32_0 = arith.constant 0 : i32
    %c0_i32_1 = arith.constant 0 : i32
    return %c0_i32, %c0_i32_0 : i32, i32
  }
  func.func @transform_2(%arg0: i32) -> (i32, i32) {
    %c0_i32 = arith.constant 0 : i32
    %c0_i32_0 = arith.constant 0 : i32
    %c0_i32_1 = arith.constant 0 : i32
    return %c0_i32, %c0_i32_0 : i32, i32
  }
  func.func @transform_3(%arg0: i32) -> (i32, i32) {
    %c0_i32 = arith.constant 0 : i32
    %c0_i32_0 = arith.constant 0 : i32
    %c0_i32_1 = arith.constant 0 : i32
    return %c0_i32, %c0_i32_0 : i32, i32
  }
  func.func @transform_4(%arg0: i32) -> (i32, i32) {
    %c0_i32 = arith.constant 0 : i32
    %c0_i32_0 = arith.constant 0 : i32
    %c0_i32_1 = arith.constant 0 : i32
    return %c0_i32, %c0_i32_0 : i32, i32
  }
  func.func @transform_5(%arg0: i32) -> (i32, i32) {
    %c0_i32 = arith.constant 0 : i32
    %c0_i32_0 = arith.constant 0 : i32
    return %arg0, %c0_i32 : i32, i32
  }
  func.func @transform_6(%arg0: i32) -> (i32, i32) {
    %c0_i32 = arith.constant 0 : i32
    %c0_i32_0 = arith.constant 0 : i32
    return %arg0, %c0_i32 : i32, i32
  }
  func.func @transform_7(%arg0: i32) -> (i32, i32, i32) {
    %c0_i32 = arith.constant 0 : i32
    %c0_i32_0 = arith.constant 0 : i32
    %c0_i32_1 = arith.constant 0 : i32
    return %arg0, %c0_i32, %c0_i32_0 : i32, i32, i32
  }
}

</mosaic_0001>

<bundles_post_ra>
// kernel: _lambda_.1
= control target key start
LH: loop header
LB: loop body
LE: loop exit
PB: predicated region body
PF: predicated region fallthrough
CT: control target
= control target key end

     0   :  { %13 = vsyncpa [#allocation3], 0  ;;  %s1140_s24 = smov [#allocation2]   ;;  %s1235_s0 = inlined_call_operand.vmem [shape: f32[2,1024], index: 0, kind: input, shape index: {}]   ;;  %s1236_s1 = inlined_call_operand.hbm [shape: bf16[1024,32], index: 1, kind: input, shape index: {}]   ;;  %s1237_s2 = inlined_call_operand.vmem [shape: f32[1,32], index: 2, kind: input, shape index: {}]   ;;  %s1238_s3 = inlined_call_operand.vmem [shape: bf16[32,3], index: 3, kind: input, shape index: {}]   ;;  %s1239_s4 = inlined_call_operand.vmem [shape: f32[1,3], index: 4, kind: input, shape index: {}]   ;;  %s1240_s5 = inlined_call_operand.vmem [shape: f32[2,3], index: 5, kind: input, shape index: {}]   ;;  %s1241_s6 = inlined_call_operand.vmem [shape: f32[2,3], index: 6, kind: output, shape index: {0}]   ;;  %s1242_s7 = inlined_call_operand.vmem [shape: f32[1,1,3], index: 7, kind: output, shape index: {1}]  }
   0x1   :  { %s21_s25 = sshll.u32 %s1140_s24, 4  ;;  %s1116_s28 = scalar_lea.hbm %s1236_s1, 8192  ;;  %s22_s25 = int_to_ptr.vmem [resolvable:$true] %s21_s25 }
   0x2   :  { %p1117_p0 = scmp.ne.s32.totalorder %s1236_s1, %s1116_s28  ;;  %p1120_p1 = scmp.lt.u32.totalorder %s1116_s28, %s1236_s1 }
   0x4   :  { %p1122_p2 = pnand %p1120_p1, %p1117_p0 }
   0x6   :  { %1125 = shalt.err (!%p1122_p2)
}
   0x7   :  { %s1126_s10 = scalar_lea.vmem %s22_s25, 8192  ;;  %p1131_p4 = scmp.lt.s32.totalorder %s22_s25, %s22_s25 }
   0x8   :  { %p1127_p3 = scmp.ne.s32.totalorder %s22_s25, %s1126_s10  ;;  %p1132_p5 = scmp.lt.s32.totalorder %s1126_s10, %s1126_s10 }
   0xa   :  { %p1133_p6 = por %p1132_p5, %p1131_p4 }
   0xc   :  { %p1134_p7 = pnand %p1133_p6, %p1127_p3 }
   0xe   :  { %1137 = shalt.err (!%p1134_p7)
}
   0xf   :  { %s1141_s11 = smov 64   ;;  %s1142_s12 = smov 4  }
  0x10   :  { %27 = dma.hbm_to_vmem [thread:$0]  %s1236_s1, 8192, %s22_s25, [#allocation3], %s1141_s11, %s1141_s11, %s1142_s12  }
  0x11   :  { %1138 = dma.done.wait [#allocation3], 8192  }
  0x12   :  { %1139 = vsyncadd [#allocation3], 4294959104  ;;  %v1048_v0 = vld [vmem:[#allocation2 + $0x40] sm:$0xff]   ;;  %v1052_v4 = vld [vmem:[#allocation2 + $0x48] sm:$0xff]   ;;  %v1143_v22 = vmov 1983009808   ;;  %v48_v24 = vlaneseq }
  0x13   :  { %v1049_v1 = vld [vmem:[#allocation2 + $0xc0] sm:$0xff]   ;;  %943 = vmatprep.subr.bf16.mxu0 %v1048_v0  ;;  %v1053_v5 = vld [vmem:[#allocation2 + $0xc8] sm:$0xff]   ;;  %v1056_v8 = vld [vmem:[#allocation2 + $0x50] sm:$0xff]   ;;  %v46_v23 = vunpack.c.l.s4 %v1143_v22  ;;  %vm1145_vm0 = vmmov 0   ;;  %vm798_vm1 = vcmask 261120   ;;  %vm842_vm2 = vcmask 17408  }
  0x14   :  { %v1050_v2 = vld [vmem:[#allocation2] sm:$0xff]   ;;  %965 = vmatprep.subr.bf16.mxu1 %v1049_v1  ;;  %v1054_v6 = vld [vmem:[#allocation2 + $0x8] sm:$0xff]   ;;  %v1057_v9 = vld [vmem:[#allocation2 + $0xd0] sm:$0xff]   ;;  %v1198_v30 = vshrl.u32 %v48_v24, 7  ;;  %vm863_vm4 = vcmask 16384  }
  0x15   :  { %v1051_v3 = vld [vmem:[#allocation2 + $0x80] sm:$0xff]   ;;  %944 = vmatpush3.bf16.msra.mxu0 %v1050_v2  ;;  %v1055_v7 = vld [vmem:[#allocation2 + $0x88] sm:$0xff]   ;;  %v1058_v10 = vld [vmem:[#allocation2 + $0x10] sm:$0xff]   ;;  %v47_v29 = vunpack.c.0.s8 %v46_v23 }
  0x16   :  { %966 = vmatpush3.bf16.msra.mxu1 %v1051_v3  ;;  %945 = vmatprep.subr.bf16.mxu0 %v1052_v4  ;;  %v1059_v11 = vld [vmem:[#allocation2 + $0x90] sm:$0xff]   ;;  %v1060_v12 = vld [vmem:[#allocation2 + $0x58] sm:$0xff]   ;;  %v1064_v16 = vld [vmem:[#allocation2 + $0x60] sm:$0xff]   ;;  %vm851_vm3 = vcmp.lt.s32.totalorder %v1198_v30, 2 }
  0x17   :  { %967 = vmatprep.subr.bf16.mxu1 %v1053_v5  ;;  %v1061_v13 = vld [vmem:[#allocation2 + $0xd8] sm:$0xff]   ;;  %v1065_v17 = vld [vmem:[#allocation2 + $0xe0] sm:$0xff]   ;;  %v1068_v20 = vld [vmem:[#allocation2 + $0x68] sm:$0xff]   ;;  %v1201_v35 = vsub.s32 %v47_v29, %v1198_v30 }
  0x18   :  { %v1062_v14 = vld [vmem:[#allocation2 + $0x18] sm:$0xff]   ;;  %v1066_v18 = vld [vmem:[#allocation2 + $0x20] sm:$0xff]   ;;  %v1069_v21 = vld [vmem:[#allocation2 + $0xe8] sm:$0xff]  }
  0x19   :  { %946 = vmatpush3.bf16.msra.mxu0 %v1054_v6  ;;  %v1063_v15 = vld [vmem:[#allocation2 + $0x98] sm:$0xff]   ;;  %v1067_v19 = vld [vmem:[#allocation2 + $0xa0] sm:$0xff]   ;;  %v1070_v25 = vld [vmem:[#allocation2 + $0x28] sm:$0xff]  }
  0x1a   :  { %968 = vmatpush3.bf16.msra.mxu1 %v1055_v7  ;;  %947 = vmatprep.subr.bf16.mxu0 %v1056_v8  ;;  %v1071_v26 = vld [vmem:[#allocation2 + $0xa8] sm:$0xff]   ;;  %v1072_v27 = vld [vmem:[#allocation2 + $0x70] sm:$0xff]   ;;  %v1076_v33 = vld [vmem:[#allocation2 + $0x78] sm:$0xff]  }
  0x1b   :  { %969 = vmatprep.subr.bf16.mxu1 %v1057_v9  ;;  %v1073_v28 = vld [vmem:[#allocation2 + $0xf0] sm:$0xff]   ;;  %v1077_v34 = vld [vmem:[#allocation2 + $0xf8] sm:$0xff]   ;;  %v40_v38 = vld [vmem:[%s1235_s0] sm:$0xff] }
  0x1c   :  { %v1074_v31 = vld [vmem:[#allocation2 + $0x30] sm:$0xff]   ;;  %v1078_v36 = vld [vmem:[#allocation2 + $0x38] sm:$0xff]   ;;  %v51_v39 = vrot.slane %v40_v38, %v1201_v35  ;;  %v44_v40 = vcombine.high %v40_v38, %v40_v38  ;;  %v1081_v41 = vld [vmem:[#allocation2 + $0x140] sm:$0xff]  }
  0x1d   :  { %948 = vmatpush3.bf16.msra.mxu0 %v1058_v10  ;;  %v1075_v32 = vld [vmem:[#allocation2 + $0xb0] sm:$0xff]   ;;  %v1079_v37 = vld [vmem:[#allocation2 + $0xb8] sm:$0xff]   ;;  %v1082_v42 = vld [vmem:[#allocation2 + $0x1c0] sm:$0xff]  }
  0x1e   :  { %970 = vmatpush3.bf16.msra.mxu1 %v1059_v11  ;;  %949 = vmatprep.subr.bf16.mxu0 %v1060_v12  ;;  %v59_v43 = vcombine.high %v51_v39, %v51_v39  ;;  %v58_v44 = vrot.slane %v44_v40, %v1201_v35  ;;  %v86_v45 = vpack.c.bf16 %v51_v39, %v51_v39  ;;  %v1083_v46 = vld [vmem:[#allocation2 + $0x100] sm:$0xff]   ;;  %v1085_v51 = vld [vmem:[#allocation2 + $0x148] sm:$0xff]   ;;  %v1089_v56 = vld [vmem:[#allocation2 + $0x150] sm:$0xff]  }
  0x1f   :  { %971 = vmatprep.subr.bf16.mxu1 %v1061_v13  ;;  %v1084_v49 = vld [vmem:[#allocation2 + $0x180] sm:$0xff]   ;;  %v1086_v53 = vld [vmem:[#allocation2 + $0x1c8] sm:$0xff]   ;;  %v1090_v57 = vld [vmem:[#allocation2 + $0x1d0] sm:$0xff]  }
  0x20   :  { %v87_v47 = vpack.c.bf16 %v59_v43, %v59_v43  ;;  %v60_v48 = vcombine.high %v58_v44, %v58_v44  ;;  %v88_v50 = vpack.c.bf16 %v58_v44, %v58_v44  ;;  %v1087_v54 = vld [vmem:[#allocation2 + $0x108] sm:$0xff]   ;;  %v1091_v58 = vld [vmem:[#allocation2 + $0x110] sm:$0xff]   ;;  %v1093_v60 = vld [vmem:[#allocation2 + $0x158] sm:$0xff]  }
  0x21   :  { %950 = vmatpush3.bf16.msra.mxu0 %v1062_v14  ;;  %v1088_v55 = vld [vmem:[#allocation2 + $0x188] sm:$0xff]   ;;  %v1092_v59 = vld [vmem:[#allocation2 + $0x190] sm:$0xff]   ;;  %v1094_v61 = vld [vmem:[#allocation2 + $0x1d8] sm:$0xff]  }
  0x22   :  { %972 = vmatpush3.bf16.msra.mxu1 %v1063_v15  ;;  %951 = vmatprep.subr.bf16.mxu0 %v1064_v16  ;;  %v89_v52 = vpack.c.bf16 %v60_v48, %v60_v48  ;;  %v1095_v62 = vld [vmem:[#allocation2 + $0x118] sm:$0xff]   ;;  %v1097_v0 = vld [vmem:[#allocation2 + $0x160] sm:$0xff]   ;;  %v1101_v4 = vld [vmem:[#allocation2 + $0x168] sm:$0xff]  }
  0x23   :  { %973 = vmatprep.subr.bf16.mxu1 %v1065_v17  ;;  %645 = vmatprep.mubr.bf16.mxu0 %v87_v47  ;;  %v1096_v63 = vld [vmem:[#allocation2 + $0x198] sm:$0xff]   ;;  %v1098_v1 = vld [vmem:[#allocation2 + $0x1e0] sm:$0xff]   ;;  %v1102_v5 = vld [vmem:[#allocation2 + $0x1e8] sm:$0xff]  }
  0x24   :  { %685 = vmatprep.mubr.bf16.mxu1 %v89_v52  ;;  %v1099_v2 = vld [vmem:[#allocation2 + $0x120] sm:$0xff]   ;;  %v1103_v6 = vld [vmem:[#allocation2 + $0x128] sm:$0xff]   ;;  %v1105_v8 = vld [vmem:[#allocation2 + $0x170] sm:$0xff]  }
  0x25   :  { %952 = vmatpush3.bf16.msra.mxu0 %v1066_v18  ;;  %v1100_v3 = vld [vmem:[#allocation2 + $0x1a0] sm:$0xff]   ;;  %v1104_v7 = vld [vmem:[#allocation2 + $0x1a8] sm:$0xff]   ;;  %v1106_v9 = vld [vmem:[#allocation2 + $0x1f0] sm:$0xff]  }
  0x26   :  { %974 = vmatpush3.bf16.msra.mxu1 %v1067_v19  ;;  %953 = vmatprep.subr.bf16.mxu0 %v1068_v20  ;;  %v1107_v10 = vld [vmem:[#allocation2 + $0x130] sm:$0xff]   ;;  %v1109_v12 = vld [vmem:[#allocation2 + $0x178] sm:$0xff]   ;;  %v41_v15 = vld [vmem:[%s1235_s0 + $0x8] sm:$0xff] }
  0x27   :  { %975 = vmatprep.subr.bf16.mxu1 %v1069_v21  ;;  %v1108_v11 = vld [vmem:[#allocation2 + $0x1b0] sm:$0xff]   ;;  %v1110_v13 = vld [vmem:[#allocation2 + $0x1f8] sm:$0xff]   ;;  %v68_v16 = vrot.slane %v41_v15, %v1201_v35  ;;  %v61_v17 = vcombine.high %v41_v15, %v41_v15 }
  0x28   :  { %v1111_v14 = vld [vmem:[#allocation2 + $0x138] sm:$0xff]  }
  0x29   :  { %954 = vmatpush3.bf16.msra.mxu0 %v1070_v25  ;;  %v1112_v18 = vld [vmem:[#allocation2 + $0x1b8] sm:$0xff]   ;;  %v76_v19 = vcombine.high %v68_v16, %v68_v16  ;;  %v75_v20 = vrot.slane %v61_v17, %v1201_v35  ;;  %v90_v21 = vpack.c.bf16 %v68_v16, %v68_v16 }
  0x2a   :  { %976 = vmatpush3.bf16.msra.mxu1 %v1071_v26  ;;  %955 = vmatprep.subr.bf16.mxu0 %v1072_v27  ;;  %v1114_v26 = vld [vmem:[%s1238_s3] sm:$0xff]   ;;  %v1144_v27 = vmov 0.0  }
  0x2b   :  { %977 = vmatprep.subr.bf16.mxu1 %v1073_v28  ;;  %v91_v22 = vpack.c.bf16 %v76_v19, %v76_v19  ;;  %v77_v23 = vcombine.high %v75_v20, %v75_v20  ;;  %v92_v24 = vpack.c.bf16 %v75_v20, %v75_v20  ;;  %v1115_v28 = vld [vmem:[%s1238_s3 + $0x8] sm:$0xff]  }
  0x2d   :  { %956 = vmatpush3.bf16.msra.mxu0 %v1074_v31  ;;  %v93_v25 = vpack.c.bf16 %v77_v23, %v77_v23  ;;  %v874_v31 = vld [vmem:[%s1237_s2] ss:$0 sm:$0xff] }
  0x2e   :  { %978 = vmatpush3.bf16.msra.mxu1 %v1075_v32  ;;  %957 = vmatprep.subr.bf16.mxu0 %v1076_v33 }
  0x2f   :  { %979 = vmatprep.subr.bf16.mxu1 %v1077_v34 }
  0x31   :  { %958 = vmatpush3.bf16.msra.mxu0 %v1078_v36 }
  0x32   :  { %980 = vmatpush3.bf16.msra.mxu1 %v1079_v37  ;;  %987 = vmatprep.subr.bf16.mxu0 %v1081_v41 }
  0x33   :  { %1009 = vmatprep.subr.bf16.mxu1 %v1082_v42 }
  0x34   :  { %646 = vmatmul.mubr.bf16.vlgmr.msra.gmra.mrb[0].mxu0 %v86_v45 }
  0x35   :  { %988 = vmatpush3.bf16.msra.mxu0 %v1083_v46  ;;  %686 = vmatmul.mubr.bf16.vlgmr.msra.gmra.mrb[0].mxu1 %v88_v50 }
  0x36   :  { %989 = vmatprep.subr.bf16.mxu0 %v1085_v51  ;;  %1010 = vmatpush3.bf16.msra.mxu1 %v1084_v49 }
  0x37   :  { %1011 = vmatprep.subr.bf16.mxu1 %v1086_v53  ;;  %725 = vmatprep.mubr.bf16.mxu0 %v91_v22 }
  0x38   :  { %765 = vmatprep.mubr.bf16.mxu1 %v93_v25 }
  0x39   :  { %990 = vmatpush3.bf16.msra.mxu0 %v1087_v54 }
  0x3a   :  { %991 = vmatprep.subr.bf16.mxu0 %v1089_v56  ;;  %1012 = vmatpush3.bf16.msra.mxu1 %v1088_v55 }
  0x3b   :  { %1013 = vmatprep.subr.bf16.mxu1 %v1090_v57  ;;  %v939_v57 = vld [vmem:[%s1239_s4] ss:$0 sm:$0xff] }
  0x3d   :  { %992 = vmatpush3.bf16.msra.mxu0 %v1091_v58 }
  0x3e   :  { %993 = vmatprep.subr.bf16.mxu0 %v1093_v60  ;;  %1014 = vmatpush3.bf16.msra.mxu1 %v1092_v59  ;;  %v849_v59 = vld [vmem:[%s1240_s5] sm:$0x3] }
  0x3f   :  { %1015 = vmatprep.subr.bf16.mxu1 %v1094_v61 }
  0x41   :  { %994 = vmatpush3.bf16.msra.mxu0 %v1095_v62 }
  0x42   :  { %995 = vmatprep.subr.bf16.mxu0 %v1097_v0  ;;  %1016 = vmatpush3.bf16.msra.mxu1 %v1096_v63 }
  0x43   :  { %1017 = vmatprep.subr.bf16.mxu1 %v1098_v1 }
  0x45   :  { %996 = vmatpush3.bf16.msra.mxu0 %v1099_v2 }
  0x46   :  { %997 = vmatprep.subr.bf16.mxu0 %v1101_v4  ;;  %1018 = vmatpush3.bf16.msra.mxu1 %v1100_v3 }
  0x47   :  { %1019 = vmatprep.subr.bf16.mxu1 %v1102_v5 }
  0x49   :  { %998 = vmatpush3.bf16.msra.mxu0 %v1103_v6 }
  0x4a   :  { %999 = vmatprep.subr.bf16.mxu0 %v1105_v8  ;;  %1020 = vmatpush3.bf16.msra.mxu1 %v1104_v7 }
  0x4b   :  { %1021 = vmatprep.subr.bf16.mxu1 %v1106_v9 }
  0x4d   :  { %1000 = vmatpush3.bf16.msra.mxu0 %v1107_v10 }
  0x4e   :  { %1001 = vmatprep.subr.bf16.mxu0 %v1109_v12  ;;  %1022 = vmatpush3.bf16.msra.mxu1 %v1108_v11 }
  0x4f   :  { %1023 = vmatprep.subr.bf16.mxu1 %v1110_v13 }
  0x51   :  { %1002 = vmatpush3.bf16.msra.mxu0 %v1111_v14 }
  0x52   :  { %1024 = vmatpush3.bf16.msra.mxu1 %v1112_v18  ;;  %1034 = vmatprep.subr.bf16.mxu0 %v1144_v27 }
  0x54   :  { %726 = vmatmul.mubr.bf16.vlgmr.msra.gmra.mrb[4].mxu0 %v90_v21 }
  0x55   :  { %766 = vmatmul.mubr.bf16.vlgmr.msra.gmra.mrb[4].mxu1 %v92_v24  ;;  %1035 = vmatpush3.bf16.msra.mxu0 %v1114_v26 }
  0x56   :  { %1036 = vmatprep.subr.bf16.mxu0 %v1144_v27  ;;  %1038 = vmatprep.mubr.msk.bf16.mxu0 %vm1145_vm0, %v1144_v27 }
  0x59   :  { %1037 = vmatpush3.bf16.msra.mxu0 %v1115_v28 }
 0x107   :  { %v959_v29 = vpop.f32.mrb[0].mxu0 }
 0x108   :  { %v960_v32 = vpop.f32.mrb[1].mxu0  ;;  %v981_v33 = vpop.f32.mrb[0].mxu1 }
 0x109   :  { %v961_v34 = vadd.f32 %v960_v32, %v959_v29  ;;  %v962_v35 = vpop.f32.mrb[2].mxu0  ;;  %v982_v36 = vpop.f32.mrb[1].mxu1 }
 0x10a   :  { %v963_v37 = vpop.f32.mrb[3].mxu0  ;;  %v983_v39 = vadd.f32 %v982_v36, %v981_v33  ;;  %v984_v40 = vpop.f32.mrb[2].mxu1 }
 0x10b   :  { %v648_v38 = vadd.f32 %v961_v34, %v874_v31  ;;  %v985_v41 = vpop.f32.mrb[3].mxu1 }
 0x10d   :  { %v688_v42 = vadd.f32 %v983_v39, %v648_v38 }
 0x127   :  { %v1003_v43 = vpop.f32.mrb[4].mxu0 }
 0x128   :  { %v1004_v44 = vpop.f32.mrb[5].mxu0  ;;  %v1025_v45 = vpop.f32.mrb[4].mxu1 }
 0x129   :  { %v1005_v46 = vadd.f32 %v1004_v44, %v1003_v43  ;;  %v1006_v47 = vpop.f32.mrb[6].mxu0  ;;  %v1026_v48 = vpop.f32.mrb[5].mxu1 }
 0x12a   :  { %v1007_v49 = vpop.f32.mrb[7].mxu0  ;;  %v1027_v51 = vadd.f32 %v1026_v48, %v1025_v45  ;;  %v1028_v52 = vpop.f32.mrb[6].mxu1 }
 0x12b   :  { %v728_v50 = vadd.f32 %v1005_v46, %v688_v42  ;;  %v1029_v53 = vpop.f32.mrb[7].mxu1 }
 0x12d   :  { %v768_v54 = vadd.f32 %v1027_v51, %v728_v50 }
 0x12f   :  { %v773_v55 = vmax.f32 %v768_v54, 0.0 }
 0x131   :  { %v774_v56 = vpack.c.bf16 %v773_v55, %v773_v55 }
 0x133   :  { %1039 = vmatmul.mubr.msk.bf16.vlgmr.msra.gmra.mrb[8].mxu0 %vm798_vm1, %v774_v56 }
 0x206   :  { %v836_v58 = vpop.f32.mrb[8].mxu0 }
 0x207   :  { %v837_v60 = vadd.f32 %v939_v57, %v836_v58  ;;  %v1040_v61 = vpop.f32.mrb[9].mxu0 }
 0x208   :  { %v839_v62 = vpop.f32.mrb[10].mxu0 }
 0x209   :  { %843 = vst.msk [vmem:[%s1241_s6] sm:$0x3] %vm842_vm2, %v837_v60  ;;  %v850_v63 = vsub.f32 %v837_v60, %v849_v59  ;;  %v1041_v0 = vpop.f32.mrb[11].mxu0 }
 0x20b   :  { %v852_v1 = vmul.f32 %v850_v63, %v850_v63 }
 0x20d   :  { %v855_v2 = vsel %vm851_vm3, %v852_v1, 0.0 }
 0x20e   :  { %v856_v3 = vsel %vm842_vm2, %v855_v2, 0.0 }
 0x20f   :  { %v857_v4 = vrot.slane %v856_v3, 4 }
 0x211   :  { %v858_v5 = vadd.f32 %v857_v4, %v856_v3 }
 0x213   :  { %v859_v6 = vrot.slane %v858_v5, 2 }
 0x215   :  { %v860_v7 = vadd.f32 %v859_v6, %v858_v5 }
 0x217   :  { %v861_v8 = vrot.slane %v860_v7, 1 }
 0x219   :  { %v862_v9 = vadd.f32 %v861_v8, %v860_v7 }
 0x21b   :  { %864 = vst.msk [vmem:[%s1242_s7] sm:$0x1] %vm863_vm4, %v862_v9 }
 0x21c   :  { %873 = vsyncpa [#allocation3], 1 }

</bundles_post_ra>
